<compile_context>
chip_gen: v7x
topology: tpu7x:2x2x1
jax: 0.10.0
libtpu: 0.0.40
codegen_flags: <defaults>
</compile_context>

<pallas_src>
import functools

import jax
import jax.numpy as jnp
from jax.experimental import pallas as pl
from jax.experimental.pallas import tpu as pltpu


def _fused_convbn_gelu_kernel(w_ref, p_ref, gamma_ref, beta_ref, o_ref,
                              sum_acc, ssq_acc, scale_s, shift_s,
                              *, n_phase, cout, inv_cnt, eps):
    """Fused transposed-conv matmul + BN stats + folded BN + exact GELU.

    grid = (2, nm); the phase axis is outermost (all M tiles of phase 0 run first).
      phase 0: y = W @ P ; accumulate per-row sum / sum-of-squares in VMEM scratch.
      p==1,i==0: fold stats + gamma/beta into per-row scale/shift (VMEM scratch).
      phase 1: y = W @ P ; o = gelu(y * scale + shift)  (lane-dense store).

    w_ref:     (RT, K)   phase-major weights, RT = s*s*Cout, K = T*T*Cin
    p_ref:     (K, BM)   im2col patch tile (flattened (n, qh, qw) on lanes)
    gamma_ref: (Cout, 1) BatchNorm gamma
    beta_ref:  (Cout, 1) BatchNorm beta
    o_ref:     (RT, BM)  output tile, written only during phase 1
    """
    p = pl.program_id(0)   # 0 = stats pass, 1 = emit pass
    i = pl.program_id(1)   # M tile index

    @pl.when(jnp.logical_and(p == 0, i == 0))
    def _init():
        sum_acc[...] = jnp.zeros_like(sum_acc)
        ssq_acc[...] = jnp.zeros_like(ssq_acc)

    # One MXU matmul per step (f32 accumulate).  Recomputed in phase 1: re-reading
    # the K-row patch tile twice is cheaper than streaming the RT-row result
    # through HBM since K < RT.  (bf16 operand cast would halve patch DMA bytes on
    # v6e/v7x but changes numerics beyond the 1e-4 parity tolerance; kept f32.)
    y = jnp.dot(w_ref[...], p_ref[...], preferred_element_type=jnp.float32)

    @pl.when(p == 0)
    def _accumulate():
        # Zero-padded M columns contribute exactly zero (no bias is added), so they
        # are harmless; inv_cnt uses the true element count.
        sum_acc[...] += jnp.sum(y, axis=1, keepdims=True)
        ssq_acc[...] += jnp.sum(y * y, axis=1, keepdims=True)

    @pl.when(jnp.logical_and(p == 1, i == 0))
    def _fold():
        # Combine the s*s per-phase row groups into per-channel stats using static,
        # sublane-aligned slices (Cout == 8 == sublane width here).
        tot_sum = sum_acc[pl.ds(0, cout), :]
        tot_ssq = ssq_acc[pl.ds(0, cout), :]
        for g in range(1, n_phase):
            tot_sum = tot_sum + sum_acc[pl.ds(g * cout, cout), :]
            tot_ssq = tot_ssq + ssq_acc[pl.ds(g * cout, cout), :]
        # TODO(synk): single-pass E[x^2]-E[x]^2 can cancel catastrophically at large
        # scale; switch to shifted sums / Welford if used beyond test-size tensors.
        mean = tot_sum * inv_cnt
        var = jnp.maximum(tot_ssq * inv_cnt - mean * mean, 0.0)
        scale_c = gamma_ref[...] * jax.lax.rsqrt(var + eps)
        shift_c = beta_ref[...] - mean * scale_c
        for g in range(n_phase):
            scale_s[pl.ds(g * cout, cout), :] = scale_c
            shift_s[pl.ds(g * cout, cout), :] = shift_c

    @pl.when(p == 1)
    def _emit():
        yb = y * scale_s[...] + shift_s[...]
        inv_sqrt2 = jnp.float32(0.7071067811865476)
        o_ref[...] = 0.5 * yb * (1.0 + jax.lax.erf(yb * inv_sqrt2))


def generater_block(x, weight, bias, gamma, beta, *, kernel, stride, eps=1e-5,
                    block_m=4096):
    """ConvTranspose2d(k, s) -> BatchNorm2d (train-mode stats) -> exact GELU.

    x: (N, Cin, H, W) NCHW.  weight: (Cin, Cout, k, k) (PyTorch ConvTranspose2d layout).
    `bias` is accepted for API parity but unused: a per-channel constant added before
    train-mode BatchNorm cancels exactly in the forward output.
    """
    del bias  # exact no-op under train-mode BatchNorm (cancels in mean subtraction)

    N, Cin, H, W = x.shape
    Cout = weight.shape[1]
    k, s = kernel, stride
    if k % s != 0:
        # TODO(synk): general polyphase with per-phase tap counts when stride does
        # not divide the kernel size (not needed for this module's k=4, s=2).
        raise NotImplementedError("generater_block requires stride to divide kernel")
    T = k // s                           # taps per spatial dim per phase
    OHp, OWp = H + T - 1, W + T - 1      # per-phase output extent
    OH, OW = s * OHp, s * OWp            # == (H-1)*s + k
    RT = s * s * Cout                    # phase-major channel rows
    K = T * T * Cin                      # matmul contraction depth
    M = N * OHp * OWp                    # flattened per-phase output positions

    # ---- layout glue (no FLOPs): polyphase im2col + phase-major weight ----
    # TODO(synk): form the T*T shifted tap views in-kernel from a halo BlockSpec on
    # the raw input to remove this materialized K*M patch buffer (next-biggest win).
    xp = jnp.pad(x, ((0, 0), (0, 0), (T - 1, T - 1), (T - 1, T - 1)))
    slabs = [xp[:, :, (T - 1 - th):(T - 1 - th) + OHp, (T - 1 - tw):(T - 1 - tw) + OWp]
             for th in range(T) for tw in range(T)]
    patches = jnp.stack(slabs, axis=0)                    # (T*T, N, Cin, OHp, OWp)
    patches = jnp.transpose(patches, (0, 2, 1, 3, 4))     # (T*T, Cin, N, OHp, OWp)
    patches = patches.reshape(K, M).astype(jnp.float32)

    # weight[ci, co, th*s+ph, tw*s+pw] -> wct[(ph*s+pw)*Cout + co, (th*T+tw)*Cin + ci]
    w6 = weight.reshape(Cin, Cout, T, s, T, s)
    wct = jnp.transpose(w6, (3, 5, 1, 2, 4, 0)).reshape(RT, K).astype(jnp.float32)

    # Pad the lane (M) dimension to a multiple of the tile (128-lane aligned).
    bm = max(128, (block_m // 128) * 128)
    m_pad = ((M + bm - 1) // bm) * bm
    patches = jnp.pad(patches, ((0, 0), (0, m_pad - M)))
    nm = m_pad // bm

    gamma_c = gamma.astype(jnp.float32).reshape(Cout, 1)
    beta_c = beta.astype(jnp.float32).reshape(Cout, 1)

    # TODO(synk): BatchNorm2d running_mean/running_var EMA buffer updates (training
    # side effect) are not reproduced; they do not affect the forward output.
    inv_cnt = 1.0 / float(N * OH * OW)

    kernel_fn = functools.partial(
        _fused_convbn_gelu_kernel,
        n_phase=s * s, cout=Cout, inv_cnt=inv_cnt, eps=float(eps))

    cost = pl.CostEstimate(
        flops=4 * RT * K * m_pad + 8 * RT * m_pad,
        transcendentals=RT * m_pad,
        bytes_accessed=4 * (2 * K * m_pad + RT * m_pad + RT * K + 2 * Cout),
    )

    # ---- fused kernel: transposed conv + BN stats + folded BN + exact GELU ----
    # Per-step VMEM footprint ~ (2*K + 2*RT)*4*bm bytes (double-buffered patch tile
    # + output tile) -- ~1.6 MiB at bm=4096, far below the 32 MiB scoped default on
    # all of v5e/v6e/v7x; no vmem_limit_bytes override needed at the default tile.
    # Both grid axes are "arbitrary": stats accumulate across M tiles and phase 1
    # depends on phase 0.
    # TODO(synk): v7x dual-TensorCore split of the stats pass (per-core partial sums
    # combined at the fold) to shard phase 0 across both cores.
    y_out = pl.pallas_call(
        kernel_fn,
        grid=(2, nm),
        in_specs=[
            pl.BlockSpec((RT, K), lambda p, i: (0, 0)),
            pl.BlockSpec((K, bm), lambda p, i: (0, i)),
            pl.BlockSpec((Cout, 1), lambda p, i: (0, 0)),
            pl.BlockSpec((Cout, 1), lambda p, i: (0, 0)),
        ],
        # Phase 0 pins the output block index at 0, so no (garbage) writeback ever
        # happens before phase 1 revisits and fully writes each tile exactly once.
        out_specs=pl.BlockSpec((RT, bm), lambda p, i: (0, i * p)),
        out_shape=jax.ShapeDtypeStruct((RT, m_pad), jnp.float32),
        scratch_shapes=[pltpu.VMEM((RT, 1), jnp.float32),   # sum accumulator
                        pltpu.VMEM((RT, 1), jnp.float32),   # sum-of-squares accum
                        pltpu.VMEM((RT, 1), jnp.float32),   # folded BN scale
                        pltpu.VMEM((RT, 1), jnp.float32)],  # folded BN shift
        compiler_params=pltpu.CompilerParams(
            dimension_semantics=("arbitrary", "arbitrary")),
        cost_estimate=cost,
    )(wct, patches, gamma_c, beta_c)

    # ---- layout glue: polyphase pixel-shuffle back to NCHW ----
    # TODO(synk): fold this interleave into the kernel's store path (per-phase /
    # strided destination slabs) to remove the remaining XLA layout pass.
    y6 = y_out[:, :M].reshape(s, s, Cout, N, OHp, OWp)        # (ph, pw, co, n, qh, qw)
    out = jnp.transpose(y6, (3, 2, 4, 0, 5, 1)).reshape(N, Cout, OH, OW)
    return out


def _reference(x, weight, bias, gamma, beta, *, kernel, stride, eps=1e-5):
    """Pure-JAX reference: ConvTranspose2d + BatchNorm2d(train) + exact GELU (NCHW)."""
    N, Cin, H, W = x.shape
    Cout = weight.shape[1]
    k, s = kernel, stride
    OH = (H - 1) * s + k
    OW = (W - 1) * s + k
    y = jnp.zeros((N, Cout, OH, OW), jnp.float32)
    for kh in range(k):
        for kw in range(k):
            contrib = jnp.einsum("nchw,co->nohw", x, weight[:, :, kh, kw],
                                 precision=jax.lax.Precision.HIGHEST)
            y = y.at[:, :, kh:kh + (H - 1) * s + 1:s, kw:kw + (W - 1) * s + 1:s].add(contrib)
    y = y + bias[None, :, None, None]
    mean = jnp.mean(y, axis=(0, 2, 3), keepdims=True)
    var = jnp.mean((y - mean) ** 2, axis=(0, 2, 3), keepdims=True)
    y = (y - mean) / jnp.sqrt(var + eps)
    y = y * gamma[None, :, None, None] + beta[None, :, None, None]
    return 0.5 * y * (1.0 + jax.scipy.special.erf(y / jnp.sqrt(2.0)))


if __name__ == "__main__":
    # Shapes consistent with the module: in_dim=4, out_dim=8, kernel=4, stride=2.
    N, Cin, Cout, H, W = 2, 4, 8, 16, 16
    kernel, stride = 4, 2

    key = jax.random.PRNGKey(0)
    kx, kw_, kb, kg, kbe = jax.random.split(key, 5)
    x = jax.random.normal(kx, (N, Cin, H, W), jnp.float32)
    # ConvTranspose2d weight: (in_dim, out_dim, kH, kW), init N(0, 0.02)
    weight = 0.02 * jax.random.normal(kw_, (Cin, Cout, kernel, kernel), jnp.float32)
    bias = 0.05 * jax.random.normal(kb, (Cout,), jnp.float32)   # cancels under train-mode BN
    gamma = 1.0 + 0.1 * jax.random.normal(kg, (Cout,), jnp.float32)
    beta = 0.1 * jax.random.normal(kbe, (Cout,), jnp.float32)

    # block_m=256 -> M=578 pads to 768 -> grid=(2, 3): exercises the fused 2-phase
    # pipeline and the cross-tile BN accumulator even at this small test size.
    fn = jax.jit(functools.partial(generater_block, kernel=kernel, stride=stride,
                                   block_m=256))
    out = jax.block_until_ready(fn(x, weight, bias, gamma, beta))

    ref = _reference(x, weight, bias, gamma, beta, kernel=kernel, stride=stride)
    OH = (H - 1) * stride + kernel
    assert out.shape == (N, Cout, OH, OH)
    err = float(jnp.max(jnp.abs(out - ref)))
    assert err < 1e-4, f"max abs error {err}"
    print("KERNEL_OK")
</pallas_src>

<mosaic_0001>
module attributes {stable_mosaic.version = 11 : i64} {
  func.func @_fused_convbn_gelu_kernel(%arg0: i32, %arg1: i32, %arg2: memref<32x16xf32, #tpu.memory_space<vmem>>, %arg3: memref<16x256xf32, #tpu.memory_space<vmem>>, %arg4: memref<8x1xf32, #tpu.memory_space<vmem>>, %arg5: memref<8x1xf32, #tpu.memory_space<vmem>>, %arg6: memref<32x256xf32, #tpu.memory_space<vmem>>, %arg7: memref<32x1xf32, #tpu.memory_space<vmem>>, %arg8: memref<32x1xf32, #tpu.memory_space<vmem>>, %arg9: memref<32x1xf32, #tpu.memory_space<vmem>>, %arg10: memref<32x1xf32, #tpu.memory_space<vmem>>) attributes {dimension_semantics = [#tpu.dimension_semantics<arbitrary>, #tpu.dimension_semantics<arbitrary>], iteration_bounds = array<i64: 2, 3>, scalar_prefetch = 0 : i64, scratch_operands = 4 : i64, tpu.core_type = #tpu.core_type<tc>, window_params = [{pipeline_mode = #tpu.pipeline_mode<synchronous>, transform_indices = @transform_0, window_bounds = array<i64: 32, 16>}, {transform_indices = @transform_1, window_bounds = array<i64: 16, 256>}, {pipeline_mode = #tpu.pipeline_mode<synchronous>, transform_indices = @transform_2, window_bounds = array<i64: 8, 1>}, {pipeline_mode = #tpu.pipeline_mode<synchronous>, transform_indices = @transform_3, window_bounds = array<i64: 8, 1>}, {transform_indices = @transform_4, window_bounds = array<i64: 32, 256>}]} {
    %c0_i32 = arith.constant 0 : i32
    %0 = arith.cmpi eq, %arg0, %c0_i32 : i32
    %c0_i32_0 = arith.constant 0 : i32
    %1 = arith.cmpi eq, %arg1, %c0_i32_0 : i32
    %2 = arith.andi %0, %1 : i1
    %3 = arith.extui %2 : i1 to i32
    %c0_i32_1 = arith.constant 0 : i32
    %4 = arith.cmpi ne, %3, %c0_i32_1 : i32
    scf.if %4 {
      %cst_11 = arith.constant 0.000000e+00 : f32
      %19 = vector.broadcast %cst_11 : f32 to vector<32x1xf32>
      %c0_12 = arith.constant 0 : index
      %c0_13 = arith.constant 0 : index
      %20 = vector.load %arg7[%c0_12, %c0_13] : memref<32x1xf32, #tpu.memory_space<vmem>>, vector<32x1xf32>
      tpu.vector_store %arg7[%c0_12, %c0_13], %19 {strides = array<i32>} : memref<32x1xf32, #tpu.memory_space<vmem>>, vector<32x1xf32>,
      %cst_14 = arith.constant 0.000000e+00 : f32
      %21 = vector.broadcast %cst_14 : f32 to vector<32x1xf32>
      %c0_15 = arith.constant 0 : index
      %c0_16 = arith.constant 0 : index
      %22 = vector.load %arg8[%c0_15, %c0_16] : memref<32x1xf32, #tpu.memory_space<vmem>>, vector<32x1xf32>
      tpu.vector_store %arg8[%c0_15, %c0_16], %21 {strides = array<i32>} : memref<32x1xf32, #tpu.memory_space<vmem>>, vector<32x1xf32>,
    } else {
    }
    %c0 = arith.constant 0 : index
    %c0_2 = arith.constant 0 : index
    %5 = vector.load %arg2[%c0, %c0_2] : memref<32x16xf32, #tpu.memory_space<vmem>>, vector<32x16xf32>
    %c0_3 = arith.constant 0 : index
    %c0_4 = arith.constant 0 : index
    %6 = vector.load %arg3[%c0_3, %c0_4] : memref<16x256xf32, #tpu.memory_space<vmem>>, vector<16x256xf32>
    %cst = arith.constant dense<0.000000e+00> : vector<32x256xf32>
    %7 = tpu.matmul %5, %6, %cst {dimension_numbers = #tpu.dot_dimension_numbers<[1], [0], [0], [1], [0, 0, 1, 1], [], []>} : vector<32x16xf32>, vector<16x256xf32>, vector<32x256xf32> -> vector<32x256xf32>
    %c0_i32_5 = arith.constant 0 : i32
    %8 = arith.cmpi eq, %arg0, %c0_i32_5 : i32
    %9 = arith.extui %8 : i1 to i32
    %c0_i32_6 = arith.constant 0 : i32
    %10 = arith.cmpi ne, %9, %c0_i32_6 : i32
    scf.if %10 {
      %c0_11 = arith.constant 0 : index
      %c0_12 = arith.constant 0 : index
      %19 = vector.load %arg7[%c0_11, %c0_12] : memref<32x1xf32, #tpu.memory_space<vmem>>, vector<32x1xf32>
      %cst_13 = arith.constant dense<0.000000e+00> : vector<32xf32>
      %20 = vector.multi_reduction <add>, %7, %cst_13 [1] : vector<32x256xf32> to vector<32xf32>
      %21 = vector.shape_cast %20 : vector<32xf32> to vector<32x1xf32>
      %22 = arith.addf %19, %21 : vector<32x1xf32>
      %c0_14 = arith.constant 0 : index
      %c0_15 = arith.constant 0 : index
      %23 = vector.load %arg7[%c0_14, %c0_15] : memref<32x1xf32, #tpu.memory_space<vmem>>, vector<32x1xf32>
      tpu.vector_store %arg7[%c0_14, %c0_15], %22 {strides = array<i32>} : memref<32x1xf32, #tpu.memory_space<vmem>>, vector<32x1xf32>,
      %c0_16 = arith.constant 0 : index
      %c0_17 = arith.constant 0 : index
      %24 = vector.load %arg8[%c0_16, %c0_17] : memref<32x1xf32, #tpu.memory_space<vmem>>, vector<32x1xf32>
      %25 = arith.mulf %7, %7 : vector<32x256xf32>
      %cst_18 = arith.constant dense<0.000000e+00> : vector<32xf32>
      %26 = vector.multi_reduction <add>, %25, %cst_18 [1] : vector<32x256xf32> to vector<32xf32>
      %27 = vector.shape_cast %26 : vector<32xf32> to vector<32x1xf32>
      %28 = arith.addf %24, %27 : vector<32x1xf32>
      %c0_19 = arith.constant 0 : index
      %c0_20 = arith.constant 0 : index
      %29 = vector.load %arg8[%c0_19, %c0_20] : memref<32x1xf32, #tpu.memory_space<vmem>>, vector<32x1xf32>
      tpu.vector_store %arg8[%c0_19, %c0_20], %28 {strides = array<i32>} : memref<32x1xf32, #tpu.memory_space<vmem>>, vector<32x1xf32>,
    } else {
    }
    %c1_i32 = arith.constant 1 : i32
    %11 = arith.cmpi eq, %arg0, %c1_i32 : i32
    %c0_i32_7 = arith.constant 0 : i32
    %12 = arith.cmpi eq, %arg1, %c0_i32_7 : i32
    %13 = arith.andi %11, %12 : i1
    %14 = arith.extui %13 : i1 to i32
    %c0_i32_8 = arith.constant 0 : i32
    %15 = arith.cmpi ne, %14, %c0_i32_8 : i32
    scf.if %15 {
      %c0_11 = arith.constant 0 : index
      %c0_12 = arith.constant 0 : index
      %19 = vector.load %arg7[%c0_11, %c0_12] : memref<32x1xf32, #tpu.memory_space<vmem>>, vector<8x1xf32>
      %c0_13 = arith.constant 0 : index
      %c0_14 = arith.constant 0 : index
      %20 = vector.load %arg8[%c0_13, %c0_14] : memref<32x1xf32, #tpu.memory_space<vmem>>, vector<8x1xf32>
      %c8 = arith.constant 8 : index
      %c0_15 = arith.constant 0 : index
      %21 = vector.load %arg7[%c8, %c0_15] : memref<32x1xf32, #tpu.memory_space<vmem>>, vector<8x1xf32>
      %22 = arith.addf %19, %21 : vector<8x1xf32>
      %c8_16 = arith.constant 8 : index
      %c0_17 = arith.constant 0 : index
      %23 = vector.load %arg8[%c8_16, %c0_17] : memref<32x1xf32, #tpu.memory_space<vmem>>, vector<8x1xf32>
      %24 = arith.addf %20, %23 : vector<8x1xf32>
      %c16 = arith.constant 16 : index
      %c0_18 = arith.constant 0 : index
      %25 = vector.load %arg7[%c16, %c0_18] : memref<32x1xf32, #tpu.memory_space<vmem>>, vector<8x1xf32>
      %26 = arith.addf %22, %25 : vector<8x1xf32>
      %c16_19 = arith.constant 16 : index
      %c0_20 = arith.constant 0 : index
      %27 = vector.load %arg8[%c16_19, %c0_20] : memref<32x1xf32, #tpu.memory_space<vmem>>, vector<8x1xf32>
      %28 = arith.addf %24, %27 : vector<8x1xf32>
      %c24 = arith.constant 24 : index
      %c0_21 = arith.constant 0 : index
      %29 = vector.load %arg7[%c24, %c0_21] : memref<32x1xf32, #tpu.memory_space<vmem>>, vector<8x1xf32>
      %30 = arith.addf %26, %29 : vector<8x1xf32>
      %c24_22 = arith.constant 24 : index
      %c0_23 = arith.constant 0 : index
      %31 = vector.load %arg8[%c24_22, %c0_23] : memref<32x1xf32, #tpu.memory_space<vmem>>, vector<8x1xf32>
      %32 = arith.addf %28, %31 : vector<8x1xf32>
      %cst_24 = arith.constant 4.32525965E-4 : f32
      %33 = vector.broadcast %cst_24 : f32 to vector<8x1xf32>
      %34 = arith.mulf %30, %33 : vector<8x1xf32>
      %cst_25 = arith.constant 4.32525965E-4 : f32
      %35 = vector.broadcast %cst_25 : f32 to vector<8x1xf32>
      %36 = arith.mulf %32, %35 : vector<8x1xf32>
      %37 = arith.mulf %34, %34 : vector<8x1xf32>
      %38 = arith.subf %36, %37 : vector<8x1xf32>
      %cst_26 = arith.constant 0.000000e+00 : f32
      %39 = vector.broadcast %cst_26 : f32 to vector<8x1xf32>
      %40 = arith.maximumf %38, %39 : vector<8x1xf32>
      %c0_27 = arith.constant 0 : index
      %c0_28 = arith.constant 0 : index
      %41 = vector.load %arg4[%c0_27, %c0_28] : memref<8x1xf32, #tpu.memory_space<vmem>>, vector<8x1xf32>
      %cst_29 = arith.constant 9.99999974E-6 : f32
      %42 = vector.broadcast %cst_29 : f32 to vector<8x1xf32>
      %43 = arith.addf %40, %42 : vector<8x1xf32>
      %44 = math.rsqrt %43 : vector<8x1xf32>
      %45 = arith.mulf %41, %44 : vector<8x1xf32>
      %c0_30 = arith.constant 0 : index
      %c0_31 = arith.constant 0 : index
      %46 = vector.load %arg5[%c0_30, %c0_31] : memref<8x1xf32, #tpu.memory_space<vmem>>, vector<8x1xf32>
      %47 = arith.mulf %34, %45 : vector<8x1xf32>
      %48 = arith.subf %46, %47 : vector<8x1xf32>
      %c0_32 = arith.constant 0 : index
      %c0_33 = arith.constant 0 : index
      %49 = vector.load %arg9[%c0_32, %c0_33] : memref<32x1xf32, #tpu.memory_space<vmem>>, vector<8x1xf32>
      tpu.vector_store %arg9[%c0_32, %c0_33], %45 {strides = array<i32>} : memref<32x1xf32, #tpu.memory_space<vmem>>, vector<8x1xf32>,
      %c0_34 = arith.constant 0 : index
      %c0_35 = arith.constant 0 : index
      %50 = vector.load %arg10[%c0_34, %c0_35] : memref<32x1xf32, #tpu.memory_space<vmem>>, vector<8x1xf32>
      tpu.vector_store %arg10[%c0_34, %c0_35], %48 {strides = array<i32>} : memref<32x1xf32, #tpu.memory_space<vmem>>, vector<8x1xf32>,
      %c8_36 = arith.constant 8 : index
      %c0_37 = arith.constant 0 : index
      %51 = vector.load %arg9[%c8_36, %c0_37] : memref<32x1xf32, #tpu.memory_space<vmem>>, vector<8x1xf32>
      tpu.vector_store %arg9[%c8_36, %c0_37], %45 {strides = array<i32>} : memref<32x1xf32, #tpu.memory_space<vmem>>, vector<8x1xf32>,
      %c8_38 = arith.constant 8 : index
      %c0_39 = arith.constant 0 : index
      %52 = vector.load %arg10[%c8_38, %c0_39] : memref<32x1xf32, #tpu.memory_space<vmem>>, vector<8x1xf32>
      tpu.vector_store %arg10[%c8_38, %c0_39], %48 {strides = array<i32>} : memref<32x1xf32, #tpu.memory_space<vmem>>, vector<8x1xf32>,
      %c16_40 = arith.constant 16 : index
      %c0_41 = arith.constant 0 : index
      %53 = vector.load %arg9[%c16_40, %c0_41] : memref<32x1xf32, #tpu.memory_space<vmem>>, vector<8x1xf32>
      tpu.vector_store %arg9[%c16_40, %c0_41], %45 {strides = array<i32>} : memref<32x1xf32, #tpu.memory_space<vmem>>, vector<8x1xf32>,
      %c16_42 = arith.constant 16 : index
      %c0_43 = arith.constant 0 : index
      %54 = vector.load %arg10[%c16_42, %c0_43] : memref<32x1xf32, #tpu.memory_space<vmem>>, vector<8x1xf32>
      tpu.vector_store %arg10[%c16_42, %c0_43], %48 {strides = array<i32>} : memref<32x1xf32, #tpu.memory_space<vmem>>, vector<8x1xf32>,
      %c24_44 = arith.constant 24 : index
      %c0_45 = arith.constant 0 : index
      %55 = vector.load %arg9[%c24_44, %c0_45] : memref<32x1xf32, #tpu.memory_space<vmem>>, vector<8x1xf32>
      tpu.vector_store %arg9[%c24_44, %c0_45], %45 {strides = array<i32>} : memref<32x1xf32, #tpu.memory_space<vmem>>, vector<8x1xf32>,
      %c24_46 = arith.constant 24 : index
      %c0_47 = arith.constant 0 : index
      %56 = vector.load %arg10[%c24_46, %c0_47] : memref<32x1xf32, #tpu.memory_space<vmem>>, vector<8x1xf32>
      tpu.vector_store %arg10[%c24_46, %c0_47], %48 {strides = array<i32>} : memref<32x1xf32, #tpu.memory_space<vmem>>, vector<8x1xf32>,
    } else {
    }
    %c1_i32_9 = arith.constant 1 : i32
    %16 = arith.cmpi eq, %arg0, %c1_i32_9 : i32
    %17 = arith.extui %16 : i1 to i32
    %c0_i32_10 = arith.constant 0 : i32
    %18 = arith.cmpi ne, %17, %c0_i32_10 : i32
    scf.if %18 {
      %c0_11 = arith.constant 0 : index
      %c0_12 = arith.constant 0 : index
      %19 = vector.load %arg9[%c0_11, %c0_12] : memref<32x1xf32, #tpu.memory_space<vmem>>, vector<32x1xf32>
      %20 = vector.broadcast %19 : vector<32x1xf32> to vector<32x256xf32>
      %21 = arith.mulf %7, %20 : vector<32x256xf32>
      %c0_13 = arith.constant 0 : index
      %c0_14 = arith.constant 0 : index
      %22 = vector.load %arg10[%c0_13, %c0_14] : memref<32x1xf32, #tpu.memory_space<vmem>>, vector<32x1xf32>
      %23 = vector.broadcast %22 : vector<32x1xf32> to vector<32x256xf32>
      %24 = arith.addf %21, %23 : vector<32x256xf32>
      %cst_15 = arith.constant 5.000000e-01 : f32
      %25 = vector.broadcast %cst_15 : f32 to vector<32x256xf32>
      %26 = arith.mulf %25, %24 : vector<32x256xf32>
      %cst_16 = arith.constant 0.707106769 : f32
      %27 = vector.broadcast %cst_16 : f32 to vector<32x256xf32>
      %28 = arith.mulf %24, %27 : vector<32x256xf32>
      %29 = math.erf %28 : vector<32x256xf32>
      %cst_17 = arith.constant 1.000000e+00 : f32
      %30 = vector.broadcast %cst_17 : f32 to vector<32x256xf32>
      %31 = arith.addf %30, %29 : vector<32x256xf32>
      %32 = arith.mulf %26, %31 : vector<32x256xf32>
      %c0_18 = arith.constant 0 : index
      %c0_19 = arith.constant 0 : index
      %33 = vector.load %arg6[%c0_18, %c0_19] : memref<32x256xf32, #tpu.memory_space<vmem>>, vector<32x256xf32>
      tpu.vector_store %arg6[%c0_18, %c0_19], %32 {strides = array<i32>} : memref<32x256xf32, #tpu.memory_space<vmem>>, vector<32x256xf32>,
    } else {
    }
    return
  }
  func.func @transform_0(%arg0: i32, %arg1: i32) -> (i32, i32) {
    %c0_i32 = arith.constant 0 : i32
    %c0_i32_0 = arith.constant 0 : i32
    %c0_i32_1 = arith.constant 0 : i32
    return %c0_i32, %c0_i32_0 : i32, i32
  }
  func.func @transform_1(%arg0: i32, %arg1: i32) -> (i32, i32) {
    %c0_i32 = arith.constant 0 : i32
    %c0_i32_0 = arith.constant 0 : i32
    return %c0_i32, %arg1 : i32, i32
  }
  func.func @transform_2(%arg0: i32, %arg1: i32) -> (i32, i32) {
    %c0_i32 = arith.constant 0 : i32
    %c0_i32_0 = arith.constant 0 : i32
    %c0_i32_1 = arith.constant 0 : i32
    return %c0_i32, %c0_i32_0 : i32, i32
  }
  func.func @transform_3(%arg0: i32, %arg1: i32) -> (i32, i32) {
    %c0_i32 = arith.constant 0 : i32
    %c0_i32_0 = arith.constant 0 : i32
    %c0_i32_1 = arith.constant 0 : i32
    return %c0_i32, %c0_i32_0 : i32, i32
  }
  func.func @transform_4(%arg0: i32, %arg1: i32) -> (i32, i32) {
    %0 = arith.muli %arg1, %arg0 : i32
    %c0_i32 = arith.constant 0 : i32
    %c0_i32_0 = arith.constant 0 : i32
    return %c0_i32, %0 : i32, i32
  }
}

</mosaic_0001>

<bundles_post_ra>
// kernel: generater_block.1
= control target key start
LH: loop header
LB: loop body
LE: loop exit
PB: predicated region body
PF: predicated region fallthrough
CT: control target
= control target key end

     0   :  { %s909_s15 = smov 0   ;;  %s911_s16 = smov 0   ;;  %s1136_s0 = inlined_call_operand.vmem [shape: f32[32,16], index: 0, kind: input, shape index: {}]   ;;  %s1137_s1 = inlined_call_operand.vmem [shape: f32[16,768], index: 1, kind: input, shape index: {}]   ;;  %s1138_s2 = inlined_call_operand.vmem [shape: f32[8,1], index: 2, kind: input, shape index: {}]   ;;  %s1139_s3 = inlined_call_operand.vmem [shape: f32[8,1], index: 3, kind: input, shape index: {}]   ;;  %s1140_s4 = inlined_call_operand.vmem [shape: f32[32,768], index: 4, kind: output, shape index: {}]  }
   0x1   :  { %s913_s17 = smov 0   ;;  %s915_s18 = smov 0  }
   0x2   :  { %s917_s19 = smov 0   ;;  %s919_s20 = smov 0  }
   0x3   :  { %s921_s21 = smov 0   ;;  %s923_s22 = smov 0  }
   0x4   :  { %s925_s23 = smov 0  }
   0x5 LB: > { %s685_s24 = sadd.s32 4294967295, %s879_s23   ;;  %s23_s25 = sadd.s32 1, %s871_s21  ;;  %s879_s23 = sphi %s925_s23, %s14_s23   ;;  %s875_s22 = sphi %s923_s22, %s1150_s22   ;;  %s871_s21 = sphi %s921_s21, %s1149_s21   ;;  %s867_s20 = sphi %s919_s20, %s1148_s20   ;;  %s863_s19 = sphi %s917_s19, %s1147_s19   ;;  %s859_s18 = sphi %s915_s18, %s1146_s18   ;;  %s855_s17 = sphi %s913_s17, %s1145_s17   ;;  %s851_s16 = sphi %s911_s16, %s1144_s16   ;;  %s847_s15 = sphi %s909_s15, %s1143_s15  }
   0x6   : > { %p24_p0 = scmp.ge.s32.totalorder %s23_s25, 3  ;;  %s26_s26 = sadd.s32 1, %s875_s22 }
   0x7   : > { %s54_s27 = sadd.s32 1, %s859_s18  ;;  %p61_p1 = scmp.ne.s32.totalorder %s859_s18, %s855_s17 }
   0x8   : > { %s1152_s25 = smov (%p24_p0, %s23_s25), 0  ;;  %s1154_s26 = smov (!%p24_p0, %s26_s26), %s875_s22 }
   0x9   : > { %s51_s28 = ssub.s32 %s871_s21, %s1152_s25  ;;  %p62_p2 = scmp.eq.s32.totalorder %s879_s23, 0 }
   0xa   : > { %p28_p3 = scmp.ge.s32.totalorder %s1154_s26, 2  ;;  %p52_p4 = scmp.eq.s32.totalorder %s51_s28, 0 }
   0xb   : > { %p966_p5 = por %p62_p2, %p61_p1  ;;  %s119_s30 = smul.u32 %s871_s21, %s875_s22 }
   0xc   : > { %s1156_s26 = smov (%p28_p3, %s1154_s26), 0  ;;  %p134_p6 = scmp.ne.s32.totalorder %s851_s16, %s847_s15 }
   0xd   : > { %s975_s5 = scalar_select %p52_p4, %s859_s18, %s54_s27  }
   0xe   : > { %s120_s6 = smul.u32 %s1156_s26, %s1152_s25  ;;  %p135_p7 = scmp.eq.s32.totalorder %s685_s24, 5 }
   0xf   : > { %s124_s8 = sadd.s32 1, %s851_s16  ;;  %p688_p10 = scmp.ge.s32.totalorder %s879_s23, 6 }
  0x10   : > { %s121_s7 = ssub.s32 %s119_s30, %s120_s6  ;;  %p982_p9 = por %p135_p7, %p134_p6 }
  0x11   : > { %p122_p8 = scmp.eq.s32.totalorder %s121_s7, 0  ;;  %166 = sbr.rel (%p688_p10) target bundleno = 31 (0x1f), region = 28 }
  0x13   : > { %s987_s10 = scalar_select %p122_p8, %s851_s16, %s124_s8  }
  0x18   : > { %169 = sbr.rel (!%p966_p5) target bundleno = 31 (0x1f), region = 32  ;;  %s171_s11 = sand.u32 (%p966_p5), 1, %s859_s18  }
  0x19   : > { %s706_s12 = sshll.u32 (%p966_p5), %s871_s21, 4  ;;  %s689_s13 = sshll.u32 (%p966_p5), %s171_s11, 5 }
  0x1a   : > { %s176_s27 = scalar_lea.vmem (%p966_p5), %s1137_s1, %s706_s12  ;;  %s173_s28 = scalar_lea.vmem (%p966_p5), [#allocation6], %s689_s13 }
  0x1b   : > { %v189_v0 = vld [vmem:[%s176_s27] sm:$0xff] (%p966_p5)  ;;  %v191_v1 = vld [vmem:[%s176_s27 + $0x8] sm:$0xff] (%p966_p5)  ;;  %v193_v2 = vld [vmem:[%s176_s27 + $0x30] sm:$0xff] (%p966_p5) }
  0x1c   : > { %190 = vst [vmem:[%s173_s28] sm:$0xff] (%p966_p5), %v189_v0  ;;  %192 = vst [vmem:[%s173_s28 + $0x8] sm:$0xff] (%p966_p5), %v191_v1  ;;  %v195_v3 = vld [vmem:[%s176_s27 + $0x38] sm:$0xff] (%p966_p5) }
  0x1d   : > { %194 = vst [vmem:[%s173_s28 + $0x10] sm:$0xff] (%p966_p5), %v193_v2  ;;  %196 = vst [vmem:[%s173_s28 + $0x18] sm:$0xff] (%p966_p5), %v195_v3 }
  0x1f PF: > { %p692_p11 = scmp.ge.s32.totalorder %s879_s23, 1  ;;  %p201_p12 = scmp.lt.s32.totalorder %s879_s23, 7 }
  0x21   : > { %p202_p13 = pnand %p692_p11, %p201_p12 }
  0x22   : > { %s208_s29 = sand.u32 (!%p202_p13), 1, %s855_s17   ;;  %s229_s30 = sand.u32 (!%p202_p13), 1, %s847_s15  }
  0x23   : > { %205 = sbr.rel (%p202_p13) target bundleno = 642 (0x282), region = 55  ;;  %s693_s6 = sshll.u32 (!%p202_p13), %s208_s29, 5 }
  0x24   : > { %s694_s7 = sshll.u32 (!%p202_p13), %s229_s30, 6  ;;  %p235_p0 = scmp.eq.s32.totalorder (!%p202_p13), %s867_s20, 0 }
  0x25   : > { %p236_p1 = scmp.eq.s32.totalorder (!%p202_p13), %s863_s19, 0  ;;  %s210_s8 = scalar_lea.vmem (!%p202_p13), [#allocation6], %s693_s6 }
  0x26   : > { %s1005_s11 = scalar_lea.vmem (!%p202_p13), [#allocation7], %s694_s7 }
  0x27   : > { %p237_p2 = pnand (!%p202_p13), %p236_p1, %p235_p0 }
  0x2a   : > { %240 = sbr.rel (%p237_p2) target bundleno = 49 (0x31), region = 63  ;;  %vm241_vm0 = vcmask (!%p237_p2), 7168   ;;  %v881_v4 = vmov (!%p237_p2), 0.0  }
  0x2b   : > { %242 = vst.msk [vmem:[#allocation2] sm:$0xff] (!%p237_p2), %vm241_vm0, %v881_v4  ;;  %243 = vst.msk [vmem:[#allocation2 + $0x8] sm:$0xff] (!%p237_p2), %vm241_vm0, %v881_v4 }
  0x2c   : > { %244 = vst.msk [vmem:[#allocation2 + $0x10] sm:$0xff] (!%p237_p2), %vm241_vm0, %v881_v4  ;;  %245 = vst.msk [vmem:[#allocation2 + $0x18] sm:$0xff] (!%p237_p2), %vm241_vm0, %v881_v4 }
  0x2d   : > { %246 = vst.msk [vmem:[#allocation3] sm:$0xff] (!%p237_p2), %vm241_vm0, %v881_v4  ;;  %247 = vst.msk [vmem:[#allocation3 + $0x8] sm:$0xff] (!%p237_p2), %vm241_vm0, %v881_v4 }
  0x2e   : > { %248 = vst.msk [vmem:[#allocation3 + $0x10] sm:$0xff] (!%p237_p2), %vm241_vm0, %v881_v4  ;;  %249 = vst.msk [vmem:[#allocation3 + $0x18] sm:$0xff] (!%p237_p2), %vm241_vm0, %v881_v4 }
  0x31 PF: > { %v255_v5 = vld [vmem:[%s210_s8 + $0x8] sm:$0xff]  ;;  %v257_v6 = vld [vmem:[%s210_s8 + $0x18] sm:$0xff]  ;;  %v254_v7 = vld [vmem:[%s210_s8] sm:$0xff]  ;;  %v882_v10 = vmov 0.0   ;;  %vm258_vm1 = vcmask 130048   ;;  %p699_p3 = scmp.ne.s32.totalorder %s867_s20, 0 }
  0x32   : > { %v708_v8 = vpack.c.bf16 %v257_v6, %v255_v5  ;;  %v256_v9 = vld [vmem:[%s210_s8 + $0x10] sm:$0xff]  ;;  %335 = vmatprep.mubr.f32.mxu0 %v882_v10  ;;  %347 = vmatprep.mubr.f32.mxu1 %v882_v10  ;;  %v250_v12 = vld [vmem:[%s1136_s0] sm:$0xff]  ;;  %v251_v14 = vld [vmem:[%s1136_s0 + $0x8] sm:$0xff]  ;;  %vm383_vm2 = vcmask (!%p699_p3), 7168  }
  0x33   : > { %v710_v11 = vpack.c.bf16 %v256_v9, %v254_v7  ;;  %v252_v13 = vld [vmem:[%s1136_s0 + $0x10] sm:$0xff]  ;;  %v253_v15 = vld [vmem:[%s1136_s0 + $0x18] sm:$0xff]  ;;  %v363_v41 = vld [vmem:[#allocation2] sm:$0xff] (!%p699_p3) }
  0x34   : > { %709 = vmatprep.subr.bf16.mxu0 %v708_v8  ;;  %712 = vmatprep.subr.bf16.mxu1 %v708_v8  ;;  %v365_v40 = vld [vmem:[#allocation2 + $0x10] sm:$0xff] (!%p699_p3)  ;;  %v366_v46 = vld [vmem:[#allocation2 + $0x18] sm:$0xff] (!%p699_p3)  ;;  %v364_v47 = vld [vmem:[#allocation2 + $0x8] sm:$0xff] (!%p699_p3) }
  0x35   : > { %711 = vmatpush1.bf16.msra.mxu0 %v710_v11  ;;  %713 = vmatpush1.bf16.msra.mxu1 %v710_v11  ;;  %v389_v52 = vld [vmem:[#allocation3 + $0x8] sm:$0xff] (!%p699_p3)  ;;  %v388_v53 = vld [vmem:[#allocation3] sm:$0xff] (!%p699_p3)  ;;  %v391_v58 = vld [vmem:[#allocation3 + $0x18] sm:$0xff] (!%p699_p3) }
  0x36   : > { %v390_v59 = vld [vmem:[#allocation3 + $0x10] sm:$0xff] (!%p699_p3) }
  0x38   : > { %695 = vmatmul.mubr.msk.f32.vlgmr.msra.gmra.mrb[0].mxu0 %vm258_vm1, %v250_v12  ;;  %697 = vmatmul.mubr.msk.f32.vlgmr.msra.gmra.mrb[0].mxu1 %vm258_vm1, %v252_v13 }
  0x39   : > { %341 = vmatprep.mubr.f32.mxu0 %v882_v10  ;;  %353 = vmatprep.mubr.f32.mxu1 %v882_v10 }
  0x3c   : > { %696 = vmatmul.mubr.msk.f32.gmra.mrb[2].mxu0 %vm258_vm1, %v251_v14  ;;  %698 = vmatmul.mubr.msk.f32.gmra.mrb[2].mxu1 %vm258_vm1, %v253_v15 }
 0x10a   : > { %362 = sbr.rel (%p699_p3) target bundleno = 428 (0x1ac), region = 67 }
 0x10b   : > { %v1019_v16 = vpop.f32.mrb[0].mxu0  ;;  %v1021_v17 = vpop.f32.mrb[0].mxu1 }
 0x10c   : > { %v1023_v18 = vpop.f32.mrb[1].mxu0  ;;  %v1025_v19 = vpop.f32.mrb[1].mxu1  ;;  %v392_v30 = vmul.f32 (!%p699_p3), %v1019_v16, %v1019_v16  ;;  %v396_v34 = vmul.f32 (!%p699_p3), %v1021_v17, %v1021_v17 }
 0x10d   : > { %v373_v24 = vadd.f32 (!%p699_p3), %v1025_v19, %v1021_v17  ;;  %v367_v25 = vadd.f32 (!%p699_p3), %v1023_v18, %v1019_v16  ;;  %v393_v31 = vmul.f32 (!%p699_p3), %v1023_v18, %v1023_v18  ;;  %v397_v37 = vmul.f32 (!%p699_p3), %v1025_v19, %v1025_v19 }
 0x10f   : > { %v1027_v20 = vpop.f32.mrb[2].mxu0  ;;  %v1029_v21 = vpop.f32.mrb[2].mxu1  ;;  %374 = vadd.xlane.f32.xlu1 (!%p699_p3), %v373_v24  ;;  %368 = vadd.xlane.f32.xlu0 (!%p699_p3), %v367_v25  ;;  %v400_v36 = vadd.f32 (!%p699_p3), %v393_v31, %v392_v30  ;;  %v406_v39 = vadd.f32 (!%p699_p3), %v397_v37, %v396_v34 }
 0x110   : > { %v1031_v22 = vpop.f32.mrb[3].mxu0  ;;  %v1033_v23 = vpop.f32.mrb[3].mxu1  ;;  %v394_v28 = vmul.f32 (!%p699_p3), %v1027_v20, %v1027_v20  ;;  %v398_v32 = vmul.f32 (!%p699_p3), %v1029_v21, %v1029_v21 }
 0x111   : > { %v376_v26 = vadd.f32 %v1033_v23, %v1029_v21  ;;  %v370_v27 = vadd.f32 %v1031_v22, %v1027_v20  ;;  %v395_v29 = vmul.f32 %v1031_v22, %v1031_v22  ;;  %v399_v33 = vmul.f32 %v1033_v23, %v1033_v23 }
 0x113   : > { %377 = vadd.xlane.f32.xlu1 %v376_v26  ;;  %371 = vadd.xlane.f32.xlu0 %v370_v27  ;;  %v403_v35 = vadd.f32 %v395_v29, %v394_v28  ;;  %v409_v38 = vadd.f32 %v399_v33, %v398_v32 }
 0x117   : > { %404 = vadd.xlane.f32.xlu1 %v403_v35  ;;  %401 = vadd.xlane.f32.xlu0 %v400_v36 }
 0x11b   : > { %410 = vadd.xlane.f32.xlu1 %v409_v38  ;;  %407 = vadd.xlane.f32.xlu0 %v406_v39 }
 0x19c   : > { %v375_v42 = vpop.xlane.xlu1 %374  ;;  %v369_v43 = vpop.xlane.xlu0 %368 }
 0x19d   : > { %v381_v44 = vadd.f32 %v375_v42, %v365_v40  ;;  %v379_v45 = vadd.f32 %v369_v43, %v363_v41 }
 0x19f   : > { %386 = vst.msk [vmem:[#allocation2 + $0x10] sm:$0xff] %vm383_vm2, %v381_v44  ;;  %384 = vst.msk [vmem:[#allocation2] sm:$0xff] %vm383_vm2, %v379_v45 }
 0x1a0   : > { %v378_v48 = vpop.xlane.xlu1 %377  ;;  %v372_v49 = vpop.xlane.xlu0 %371 }
 0x1a1   : > { %v382_v50 = vadd.f32 %v378_v48, %v366_v46  ;;  %v380_v51 = vadd.f32 %v372_v49, %v364_v47 }
 0x1a3   : > { %387 = vst.msk [vmem:[#allocation2 + $0x18] sm:$0xff] %vm383_vm2, %v382_v50  ;;  %385 = vst.msk [vmem:[#allocation2 + $0x8] sm:$0xff] %vm383_vm2, %v380_v51 }
 0x1a4   : > { %v405_v54 = vpop.xlane.xlu1 %404  ;;  %v402_v55 = vpop.xlane.xlu0 %401 }
 0x1a5   : > { %v413_v56 = vadd.f32 %v405_v54, %v389_v52  ;;  %v412_v57 = vadd.f32 %v402_v55, %v388_v53 }
 0x1a7   : > { %417 = vst.msk [vmem:[#allocation3 + $0x8] sm:$0xff] %vm383_vm2, %v413_v56  ;;  %416 = vst.msk [vmem:[#allocation3] sm:$0xff] %vm383_vm2, %v412_v57 }
 0x1a8   : > { %v411_v60 = vpop.xlane.xlu1 %410  ;;  %v408_v61 = vpop.xlane.xlu0 %407 }
 0x1a9   : > { %v415_v62 = vadd.f32 %v411_v60, %v391_v58  ;;  %v414_v63 = vadd.f32 %v408_v61, %v390_v59 }
 0x1ab   : > { %419 = vst.msk [vmem:[#allocation3 + $0x18] sm:$0xff] %vm383_vm2, %v415_v62  ;;  %418 = vst.msk [vmem:[#allocation3 + $0x10] sm:$0xff] %vm383_vm2, %v414_v63 }
 0x1ac PF: > { %p420_p4 = scmp.eq.s32.totalorder %s867_s20, 1 }
 0x1ae   : > { %p421_p5 = pnand %p420_p4, %p236_p1 }
 0x1af   : > { %v425_v0 = vld [vmem:[#allocation2] sm:$0xff] (!%p421_p5)  ;;  %v427_v2 = vld [vmem:[#allocation2 + $0x8] sm:$0xff] (!%p421_p5)  ;;  %v431_v5 = vld [vmem:[#allocation2 + $0x10] sm:$0xff] (!%p421_p5)  ;;  %vm451_vm3 = vcmask (!%p421_p5), 7168  }
 0x1b0   : > { %424 = sbr.rel (%p421_p5) target bundleno = 467 (0x1d3), region = 71  ;;  %v426_v1 = vld [vmem:[#allocation3] sm:$0xff] (!%p421_p5)  ;;  %v428_v3 = vadd.f32 (!%p421_p5), %v427_v2, %v425_v0  ;;  %v429_v4 = vld [vmem:[#allocation3 + $0x8] sm:$0xff] (!%p421_p5)  ;;  %v435_v8 = vld [vmem:[#allocation2 + $0x18] sm:$0xff] (!%p421_p5) }
 0x1b1   : > { %v430_v7 = vadd.f32 (!%p421_p5), %v429_v4, %v426_v1  ;;  %v444_v28 = vld [vmem:[%s1138_s2] sm:$0xff] (!%p421_p5) }
 0x1b2   : > { %v433_v6 = vld [vmem:[#allocation3 + $0x10] sm:$0xff] (!%p421_p5)  ;;  %v432_v9 = vadd.f32 (!%p421_p5), %v431_v5, %v428_v3  ;;  %v437_v10 = vld [vmem:[#allocation3 + $0x18] sm:$0xff] (!%p421_p5)  ;;  %v448_v31 = vld [vmem:[%s1139_s3] sm:$0xff] (!%p421_p5) }
 0x1b3   : > { %v434_v11 = vadd.f32 (!%p421_p5), %v433_v6, %v430_v7 }
 0x1b4   : > { %v436_v12 = vadd.f32 (!%p421_p5), %v435_v8, %v432_v9 }
 0x1b5   : > { %v438_v13 = vadd.f32 (!%p421_p5), %v437_v10, %v434_v11 }
 0x1b6   : > { %v439_v14 = vmul.f32 (!%p421_p5), 0.00043252597, %v436_v12 }
 0x1b7   : > { %v440_v15 = vmul.f32 0.00043252597, %v438_v13 }
 0x1b8   : > { %v441_v24 = vmul.f32 %v439_v14, %v439_v14 }
 0x1ba   : > { %v442_v25 = vsub.f32 %v440_v15, %v441_v24 }
 0x1bc   : > { %v443_v26 = vmax.f32 %v442_v25, 0.0 }
 0x1be   : > { %v445_v27 = vadd.f32 1e-05, %v443_v26 }
 0x1c0   : > { %789 = vrsqrt.f32 %v445_v27 }
 0x1ca   : > { %v790_v29 = vpop.eup %789 }
 0x1cb   : > { %v447_v30 = vmul.f32 %v790_v29, %v444_v28 }
 0x1cd   : > { %452 = vst.msk [vmem:[#allocation4] sm:$0xff] %vm451_vm3, %v447_v30  ;;  %454 = vst.msk [vmem:[#allocation4 + $0x8] sm:$0xff] %vm451_vm3, %v447_v30  ;;  %v449_v32 = vmul.f32 %v447_v30, %v439_v14 }
 0x1ce   : > { %456 = vst.msk [vmem:[#allocation4 + $0x10] sm:$0xff] %vm451_vm3, %v447_v30  ;;  %458 = vst.msk [vmem:[#allocation4 + $0x18] sm:$0xff] %vm451_vm3, %v447_v30 }
 0x1cf   : > { %v450_v33 = vsub.f32 %v448_v31, %v449_v32 }
 0x1d1   : > { %453 = vst.msk [vmem:[#allocation5] sm:$0xff] %vm451_vm3, %v450_v33  ;;  %455 = vst.msk [vmem:[#allocation5 + $0x8] sm:$0xff] %vm451_vm3, %v450_v33 }
 0x1d2   : > { %457 = vst.msk [vmem:[#allocation5 + $0x10] sm:$0xff] %vm451_vm3, %v450_v33  ;;  %459 = vst.msk [vmem:[#allocation5 + $0x18] sm:$0xff] %vm451_vm3, %v450_v33 }
 0x1d3 PF: > { %p700_p6 = scmp.ne.s32.totalorder %s867_s20, 1 }
 0x1d4   : > { %v463_v35 = vld [vmem:[#allocation4] sm:$0xff] (!%p700_p6)  ;;  %v883_v36 = vmov (!%p700_p6), 0   ;;  %v464_v38 = vld [vmem:[#allocation4 + $0x8] sm:$0xff] (!%p700_p6) }
 0x1d5   : > { %462 = sbr.rel (%p700_p6) target bundleno = 633 (0x279), region = 75  ;;  %v465_v34 = vld [vmem:[#allocation4 + $0x10] sm:$0xff] (!%p700_p6)  ;;  %792 = vset.pattern.permute.xlu1 (!%p700_p6), %v883_v36  ;;  %791 = vset.pattern.permute.xlu0 (!%p700_p6), %v883_v36  ;;  %v466_v37 = vld [vmem:[#allocation4 + $0x18] sm:$0xff] (!%p700_p6) }
 0x1d6   : > { %479 = vperm.xlu1 (!%p700_p6), %792, %v465_v34   ;;  %469 = vperm.xlu0 (!%p700_p6), %791, %v463_v35  }
 0x1d8   : > { %v496_v39 = vld [vmem:[#allocation5 + $0x8] sm:$0xff] (!%p700_p6)  ;;  %v495_v40 = vld [vmem:[#allocation5] sm:$0xff] (!%p700_p6) }
 0x1d9   : > { %v498_v41 = vld [vmem:[#allocation5 + $0x18] sm:$0xff] (!%p700_p6)  ;;  %v497_v42 = vld [vmem:[#allocation5 + $0x10] sm:$0xff] (!%p700_p6) }
 0x1da   : > { %484 = vperm.xlu1 (!%p700_p6), %792, %v466_v37   ;;  %474 = vperm.xlu0 (!%p700_p6), %791, %v464_v38  }
 0x1de   : > { %506 = vperm.xlu1 %792, %v496_v39   ;;  %501 = vperm.xlu0 %791, %v495_v40  }
 0x1e2   : > { %516 = vperm.xlu1 %792, %v498_v41   ;;  %511 = vperm.xlu0 %791, %v497_v42  }
 0x255   : > { %v480_v43 = vpop.permute.xlu1 %479  ;;  %v470_v44 = vpop.permute.xlu0 %469 }
 0x256   : > { %v487_v47 = vmul.f32 %v470_v44, %v1019_v16  ;;  %v488_v48 = vmul.f32 %v470_v44, %v1023_v18  ;;  %v491_v57 = vmul.f32 %v480_v43, %v1021_v17  ;;  %v492_v18 = vmul.f32 %v480_v43, %v1025_v19 }
 0x259   : > { %v485_v45 = vpop.permute.xlu1 %484  ;;  %v475_v46 = vpop.permute.xlu0 %474 }
 0x25a   : > { %v489_v49 = vmul.f32 %v475_v46, %v1027_v20  ;;  %v490_v50 = vmul.f32 %v475_v46, %v1031_v22  ;;  %v493_v58 = vmul.f32 %v485_v45, %v1029_v21  ;;  %v494_v59 = vmul.f32 %v485_v45, %v1033_v23 }
 0x25d   : > { %v507_v51 = vpop.permute.xlu1 %506  ;;  %v502_v52 = vpop.permute.xlu0 %501 }
 0x25e   : > { %v521_v53 = vadd.f32 %v507_v51, %v489_v49  ;;  %v522_v54 = vadd.f32 %v507_v51, %v490_v50  ;;  %v519_v55 = vadd.f32 %v502_v52, %v487_v47  ;;  %v520_v56 = vadd.f32 %v502_v52, %v488_v48 }
 0x260   : > { %v537_v60 = vmul.f32 0.70710677, %v521_v53  ;;  %v538_v16 = vmul.f32 0.70710677, %v522_v54  ;;  %v535_v61 = vmul.f32 0.70710677, %v519_v55 }
 0x261   : > { %v536_v20 = vmul.f32 0.70710677, %v520_v56  ;;  %v517_v62 = vpop.permute.xlu1 %516  ;;  %v512_v22 = vpop.permute.xlu0 %511  ;;  %v529_v5 = vmul.f32 0.5, %v521_v53  ;;  %v530_v8 = vmul.f32 0.5, %v522_v54  ;;  %v527_v12 = vmul.f32 0.5, %v519_v55 }
 0x262   : > { %793 = verf.f32 %v537_v60  ;;  %v525_v63 = vadd.f32 %v517_v62, %v493_v58  ;;  %v526_v0 = vadd.f32 %v517_v62, %v494_v59  ;;  %v523_v1 = vadd.f32 %v512_v22, %v491_v57 }
 0x263   : > { %795 = verf.f32 %v538_v16  ;;  %v524_v2 = vadd.f32 %v512_v22, %v492_v18  ;;  %v528_v24 = vmul.f32 0.5, %v520_v56 }
 0x264   : > { %797 = verf.f32 %v535_v61  ;;  %v541_v17 = vmul.f32 0.70710677, %v525_v63  ;;  %v542_v21 = vmul.f32 0.70710677, %v526_v0  ;;  %v539_v23 = vmul.f32 0.70710677, %v523_v1 }
 0x265   : > { %799 = verf.f32 %v536_v20  ;;  %v540_v3 = vmul.f32 0.70710677, %v524_v2  ;;  %v533_v28 = vmul.f32 0.5, %v525_v63  ;;  %v534_v32 = vmul.f32 0.5, %v526_v0 }
 0x266   : > { %801 = verf.f32 %v541_v17  ;;  %v531_v36 = vmul.f32 0.5, %v523_v1  ;;  %v532_v39 = vmul.f32 0.5, %v524_v2 }
 0x267   : > { %803 = verf.f32 %v542_v21 }
 0x268   : > { %805 = verf.f32 %v539_v23 }
 0x269   : > { %807 = verf.f32 %v540_v3 }
 0x26c   : > { %v794_v19 = vpop.eup %793 }
 0x26d   : > { %v796_v4 = vpop.eup %795  ;;  %v553_v6 = vadd.f32 1.0, %v794_v19 }
 0x26e   : > { %v798_v7 = vpop.eup %797  ;;  %v554_v9 = vadd.f32 1.0, %v796_v4 }
 0x26f   : > { %v800_v10 = vpop.eup %799  ;;  %v561_v11 = vmul.f32 %v553_v6, %v529_v5  ;;  %v551_v13 = vadd.f32 1.0, %v798_v7 }
 0x270   : > { %v802_v14 = vpop.eup %801  ;;  %v562_v15 = vmul.f32 %v554_v9, %v530_v8  ;;  %v552_v25 = vadd.f32 1.0, %v800_v10 }
 0x271   : > { %v804_v26 = vpop.eup %803  ;;  %569 = vst [vmem:[%s1005_s11 + $0x10] sm:$0xff] %v561_v11  ;;  %v559_v27 = vmul.f32 %v551_v13, %v527_v12  ;;  %v557_v29 = vadd.f32 1.0, %v802_v14 }
 0x272   : > { %v806_v30 = vpop.eup %805  ;;  %570 = vst [vmem:[%s1005_s11 + $0x18] sm:$0xff] %v562_v15  ;;  %v560_v31 = vmul.f32 %v552_v25, %v528_v24  ;;  %v558_v33 = vadd.f32 1.0, %v804_v26 }
 0x273   : > { %v808_v34 = vpop.eup %807  ;;  %567 = vst [vmem:[%s1005_s11] sm:$0xff] %v559_v27  ;;  %v565_v35 = vmul.f32 %v557_v29, %v533_v28  ;;  %v555_v37 = vadd.f32 1.0, %v806_v30 }
 0x274   : > { %568 = vst [vmem:[%s1005_s11 + $0x8] sm:$0xff] %v560_v31  ;;  %v566_v38 = vmul.f32 %v558_v33, %v534_v32  ;;  %v556_v40 = vadd.f32 1.0, %v808_v34 }
 0x275   : > { %573 = vst [vmem:[%s1005_s11 + $0x30] sm:$0xff] %v565_v35  ;;  %v563_v41 = vmul.f32 %v555_v37, %v531_v36 }
 0x276   : > { %574 = vst [vmem:[%s1005_s11 + $0x38] sm:$0xff] %v566_v38  ;;  %v564_v42 = vmul.f32 %v556_v40, %v532_v39 }
 0x277   : > { %571 = vst [vmem:[%s1005_s11 + $0x20] sm:$0xff] %v563_v41 }
 0x278   : > { %572 = vst [vmem:[%s1005_s11 + $0x28] sm:$0xff] %v564_v42 }
 0x279 PF: > { %581 = sbr.rel (!%p982_p9) target bundleno = 642 (0x282), region = 79  ;;  %v602_v45 = vld [vmem:[%s1005_s11 + $0x10] sm:$0xff] (%p982_p9)  ;;  %v604_v46 = vld [vmem:[%s1005_s11 + $0x18] sm:$0xff] (%p982_p9) }
 0x27a   : > { %s582_s8 = smul.u32 (%p982_p9), %s863_s19, %s867_s20  ;;  %v598_v43 = vld [vmem:[%s1005_s11] sm:$0xff] (%p982_p9) }
 0x27b   : > { %v600_v44 = vld [vmem:[%s1005_s11 + $0x8] sm:$0xff] (%p982_p9) }
 0x27c   : > { %s707_s15 = sshll.u32 (%p982_p9), %s582_s8, 4  ;;  %v610_v49 = vld [vmem:[%s1005_s11 + $0x30] sm:$0xff] (%p982_p9) }
 0x27d   : > { %v612_v50 = vld [vmem:[%s1005_s11 + $0x38] sm:$0xff] (%p982_p9)  ;;  %s585_s12 = scalar_lea.vmem (%p982_p9), %s1140_s4, %s707_s15 }
 0x27e   : > { %v606_v47 = vld [vmem:[%s1005_s11 + $0x20] sm:$0xff] (%p982_p9)  ;;  %599 = vst [vmem:[%s585_s12] sm:$0xff] (%p982_p9), %v598_v43  ;;  %601 = vst [vmem:[%s585_s12 + $0x8] sm:$0xff] (%p982_p9), %v600_v44 }
 0x27f   : > { %v608_v48 = vld [vmem:[%s1005_s11 + $0x28] sm:$0xff] (%p982_p9)  ;;  %603 = vst [vmem:[%s585_s12 + $0x30] sm:$0xff] (%p982_p9), %v602_v45  ;;  %605 = vst [vmem:[%s585_s12 + $0x38] sm:$0xff] (%p982_p9), %v604_v46 }
 0x280   : > { %607 = vst [vmem:[%s585_s12 + $0x60] sm:$0xff] %v606_v47  ;;  %609 = vst [vmem:[%s585_s12 + $0x68] sm:$0xff] %v608_v48 }
 0x281   : > { %611 = vst [vmem:[%s585_s12 + $0x90] sm:$0xff] %v610_v49  ;;  %613 = vst [vmem:[%s585_s12 + $0x98] sm:$0xff] %v612_v50 }
 0x282 PF: > { %s14_s23 = sadd.s32 1, %s879_s23   ;;  %s1143_s15 = smov %s851_s16 }
 0x283   : > { %p11_p7 = scmp.ge.s32.totalorder %s14_s23, 8   ;;  %s1144_s16 = smov %s987_s10 }
 0x284   : > { %s1145_s17 = smov %s859_s18  ;;  %s1146_s18 = smov %s975_s5 }
 0x285   : > { %s1147_s19 = smov %s871_s21  ;;  %s1148_s20 = smov %s875_s22 }
 0x286   : > { %s1149_s21 = smov %s1152_s25  ;;  %s1150_s22 = smov %s1156_s26 }
 0x287   :  { %13 = sbr.rel (!%p11_p7) target bundleno = 5 (0x5), region = 133 }

</bundles_post_ra>
